<compile_context>
chip_gen: v5e
topology: v5e:2x2
jax: 0.10.0
libtpu: 0.0.40
codegen_flags: <defaults>
</compile_context>

<pallas_src>
import functools

import jax
import jax.numpy as jnp
from jax import lax
from jax.experimental import pallas as pl
from jax.experimental.pallas import tpu as pltpu


def _round_up(x, m):
    return ((x + m - 1) // m) * m


def _sigmoid_via_tanh(x):
    # sigmoid(x) = 0.5 * (tanh(0.5 x) + 1): one EUP op instead of exp + reciprocal.
    return 0.5 * jnp.tanh(0.5 * x) + 0.5


# --------------------------------------------------------------------------- #
# Per-step kernel (matches the torch module's forward: one LSTM step per call) #
# --------------------------------------------------------------------------- #
def _lstm_cell_kernel(h_ref, x_ref, c_ref, w_ref, b_ref, h_out_ref, c_out_ref):
    hg = c_out_ref.shape[-1]                             # padded per-gate width
    # [h | x] is pre-placed into disjoint column ranges of two (bp, Kp) bf16
    # operands, so their sum IS the concatenation -> one fused MXU matmul.
    hx = h_ref[...] + x_ref[...]
    z = jnp.dot(hx, w_ref[...], preferred_element_type=jnp.float32)
    z = z + b_ref[...]                                   # (1, 4Hg) broadcast

    ft = _sigmoid_via_tanh(z[:, 0 * hg:1 * hg])
    it = _sigmoid_via_tanh(z[:, 1 * hg:2 * hg])
    ot = _sigmoid_via_tanh(z[:, 2 * hg:3 * hg])
    gt = jnp.tanh(z[:, 3 * hg:4 * hg])

    c_new = ft * c_ref[...] + it * gt                    # cell state stays f32
    c_out_ref[...] = c_new
    h_out_ref[...] = (ot * jnp.tanh(c_new)).astype(h_out_ref.dtype)


@functools.partial(jax.jit, donate_argnums=(2,))
def _lstm_step(h_p, x_p, c_p, w4, b4):
    bp, hg = c_p.shape
    vmem = pl.BlockSpec(memory_space=pltpu.MemorySpace.VMEM)
    return pl.pallas_call(
        _lstm_cell_kernel,
        out_shape=(jax.ShapeDtypeStruct((bp, hg), jnp.float32),    # hidden
                   jax.ShapeDtypeStruct((bp, hg), jnp.float32)),   # cell
        in_specs=[vmem] * 5,
        out_specs=(vmem, vmem),
        input_output_aliases={2: 1},      # cell state updated in place
    )(h_p, x_p, c_p, w4, b4)


# --------------------------------------------------------------------------- #
# Time-blocked, weight-stationary sequence kernel (grid over T // TB)          #
# --------------------------------------------------------------------------- #
def _lstm_seq_kernel(x_ref, h0_ref, c0_ref, w_ref, b_ref,
                     hseq_ref, clast_ref, h_sc, *, tb, t_real, hg, mask):
    blk = pl.program_id(0)

    @pl.when(blk == 0)
    def _init():
        h_sc[...] = h0_ref[...]          # (bp, Kp) f32; zeros outside h columns
        clast_ref[...] = c0_ref[...]     # resident output block doubles as c carry

    def step(tt, carry):
        hx = x_ref[tt] + h_sc[...].astype(jnp.bfloat16)            # (bp, Kp) bf16
        z = jnp.dot(hx, w_ref[...], preferred_element_type=jnp.float32)
        z = z + b_ref[...]

        ft = _sigmoid_via_tanh(z[:, 0 * hg:1 * hg])
        it = _sigmoid_via_tanh(z[:, 1 * hg:2 * hg])
        ot = _sigmoid_via_tanh(z[:, 2 * hg:3 * hg])
        gt = jnp.tanh(z[:, 3 * hg:4 * hg])

        c_new = ft * clast_ref[...] + it * gt                       # f32 carry
        h_new = ot * jnp.tanh(c_new)

        if mask:   # only emitted when T was padded up to a multiple of TB
            keep = (blk * tb + tt) < t_real
            c_new = jnp.where(keep, c_new, clast_ref[...])
            h_new = jnp.where(keep, h_new, h_sc[:, 0:hg])

        clast_ref[...] = c_new
        h_sc[:, 0:hg] = h_new            # lane-aligned store (hg % 128 == 0)
        hseq_ref[tt] = h_new.astype(hseq_ref.dtype)                 # bf16 writeback
        return carry

    lax.fori_loop(0, tb, step, 0, unroll=True)


@functools.partial(jax.jit, static_argnames=("tb", "t_real"))
def _lstm_sequence(x_p, h0_p, c0_p, w4, b4, *, tb, t_real):
    t_pad, bp, kp = x_p.shape
    hg = c0_p.shape[-1]
    nblk = t_pad // tb

    # VMEM budget: resident weights/bias/state + double-buffered x/hseq blocks.
    need = (w4.size * 2 + b4.size * 4 + h0_p.size * 4 + 2 * c0_p.size * 4
            + 2 * tb * bp * kp * 2 + 2 * tb * bp * hg * 2 + bp * kp * 4)
    vmem_limit = int(min(max(2 * need + (2 << 20), 16 << 20), 64 << 20))

    kernel = functools.partial(_lstm_seq_kernel, tb=tb, t_real=t_real, hg=hg,
                               mask=(t_pad != t_real))
    return pl.pallas_call(
        kernel,
        out_shape=(jax.ShapeDtypeStruct((t_pad, bp, hg), jnp.bfloat16),
                   jax.ShapeDtypeStruct((bp, hg), jnp.float32)),
        grid_spec=pltpu.PrefetchScalarGridSpec(
            num_scalar_prefetch=0,
            grid=(nblk,),
            in_specs=[
                pl.BlockSpec((tb, bp, kp), lambda b: (b, 0, 0)),   # x time-block
                pl.BlockSpec((bp, kp), lambda b: (0, 0)),          # h0 (t==0 only)
                pl.BlockSpec((bp, hg), lambda b: (0, 0)),          # c0 (t==0 only)
                pl.BlockSpec((kp, 4 * hg), lambda b: (0, 0)),      # fused W resident
                pl.BlockSpec((1, 4 * hg), lambda b: (0, 0)),       # bias resident
            ],
            out_specs=[
                pl.BlockSpec((tb, bp, hg), lambda b: (b, 0, 0)),   # hseq streamed out
                pl.BlockSpec((bp, hg), lambda b: (0, 0)),          # final cell (resident)
            ],
            scratch_shapes=[pltpu.VMEM((bp, kp), jnp.float32)],    # h carry (f32)
        ),
        compiler_params=pltpu.CompilerParams(
            dimension_semantics=("arbitrary",),                    # true recurrence
            vmem_limit_bytes=vmem_limit),
    )(x_p, h0_p, c0_p, w4, b4)


# --------------------------------------------------------------------------- #
# Module wrapper (forward semantics of the torch LSTM cell)                    #
# --------------------------------------------------------------------------- #
class LSTMPallas:
    """JAX/Pallas port of the PyTorch LSTM cell module (forward semantics only)."""

    def __init__(self, input_size, hidden_size, key, time_block=8):
        self.input_size = input_size
        self.hidden_size = hidden_size
        self.time_block = time_block
        H, I = hidden_size, input_size
        D = I + H
        kf, ki, ko, kg, kb = jax.random.split(key, 5)

        # Xavier-normal weights, shape (hidden_size, D) like nn.Linear.weight.
        std = (2.0 / (D + hidden_size)) ** 0.5
        self.Wf = std * jax.random.normal(kf, (H, D), jnp.float32)
        self.Wi = std * jax.random.normal(ki, (H, D), jnp.float32)
        self.Wo = std * jax.random.normal(ko, (H, D), jnp.float32)
        self.Wg = std * jax.random.normal(kg, (H, D), jnp.float32)

        # nn.Linear default bias init: U(-1/sqrt(D), 1/sqrt(D)).
        bound = 1.0 / (D ** 0.5)
        bkf, bki, bko, bkg = jax.random.split(kb, 4)
        self.bf = jax.random.uniform(bkf, (H,), jnp.float32, -bound, bound)
        self.bi = jax.random.uniform(bki, (H,), jnp.float32, -bound, bound)
        self.bo = jax.random.uniform(bko, (H,), jnp.float32, -bound, bound)
        self.bg = jax.random.uniform(bkg, (H,), jnp.float32, -bound, bound)

        # Torch module sets self.V every forward(); it is constant, build once.
        self.V = jnp.stack([self.Wf, self.Wi, self.Wo, self.Wg])

        # Kernel-side fused weight: K dim carries [hidden | x], padded so that the
        # concatenation fits one 128-lane tile when H + I <= 128 (demo case), or
        # two lane-aligned slabs otherwise.  4 gates fused along the output axis.
        Hg = _round_up(H, 128)                 # per-gate (and hidden-output) width
        if H + I <= 128:
            Kp, x_off = 128, H                 # compact: K halved vs Hp + Ip
        else:
            Kp, x_off = Hg + _round_up(I, 128), Hg
        self.Hg, self.Kp, self.x_off = Hg, Kp, x_off

        def pack(w):                           # w: (H, D), columns = [hidden | x]
            wt = w.T                           # (D, H)
            out = jnp.zeros((Kp, Hg), jnp.float32)
            out = out.at[0:H, 0:H].set(wt[:H])                       # hidden part
            out = out.at[x_off:x_off + I, 0:H].set(wt[H:])           # x part
            return out

        self.W4 = jnp.concatenate(
            [pack(w) for w in (self.Wf, self.Wi, self.Wo, self.Wg)],
            axis=1).astype(jnp.bfloat16)                             # (Kp, 4Hg)
        self.b4 = jnp.concatenate(
            [jnp.zeros((Hg,), jnp.float32).at[:H].set(b)
             for b in (self.bf, self.bi, self.bo, self.bg)]).reshape(1, 4 * Hg)

        self.ct_p = None   # padded f32 cell state, shape (Bp, Hg)

    # -- state handling ------------------------------------------------------
    def init_states(self, batch_size):
        self.ct_p = jnp.zeros((_round_up(batch_size, 16), self.Hg), jnp.float32)

    def _ensure_cell(self, bp):
        if self.ct_p is None:
            self.ct_p = jnp.zeros((bp, self.Hg), jnp.float32)
        elif self.ct_p.shape[0] != bp:
            # Mirror torch's self.ct[:B] slicing; grow with zeros if batch grew.
            keep = min(bp, self.ct_p.shape[0])
            self.ct_p = jnp.zeros((bp, self.Hg), jnp.float32).at[:keep].set(
                self.ct_p[:keep])

    def _embed_h(self, h, bp, width):
        out = jnp.zeros((bp, width), jnp.float32)
        return out.at[:h.shape[0], :self.hidden_size].set(h.astype(jnp.float32))

    def _embed_x(self, x, bp):
        out = jnp.zeros((bp, self.Kp), jnp.float32)
        return out.at[:x.shape[0],
                      self.x_off:self.x_off + self.input_size].set(
                          x.astype(jnp.float32))

    # -- per-step path (torch-parity; not the fast path for sequences) --------
    def forward(self, x, hidden, reset=False):
        B = x.shape[0]
        bp = _round_up(B, 16)
        if hidden is None or reset:
            if hidden is None:
                hidden = jnp.zeros((B, self.hidden_size), jnp.float32)
                self.init_states(B)
            else:
                hidden = lax.stop_gradient(hidden)
                self._ensure_cell(bp)
                self.ct_p = lax.stop_gradient(self.ct_p)
        self._ensure_cell(bp)

        h_p = self._embed_h(hidden, bp, self.Kp).astype(jnp.bfloat16)
        x_p = self._embed_x(x, bp).astype(jnp.bfloat16)
        h_new_p, c_new_p = _lstm_step(h_p, x_p, self.ct_p, self.W4, self.b4)
        self.ct_p = c_new_p
        hidden_out = h_new_p[:B, :self.hidden_size]
        return hidden_out, (None, None), None

    # -- weight-stationary, time-blocked sequence path ------------------------
    def forward_sequence(self, x_seq, h0=None, c0=None):
        T, B, _ = x_seq.shape
        bp = _round_up(B, 16)
        tb = max(1, min(self.time_block, T))
        t_pad = _round_up(T, tb)

        x_p = jnp.zeros((t_pad, bp, self.Kp), jnp.float32)
        x_p = x_p.at[:T, :B, self.x_off:self.x_off + self.input_size].set(
            x_seq.astype(jnp.float32)).astype(jnp.bfloat16)
        h0_p = (jnp.zeros((bp, self.Kp), jnp.float32) if h0 is None
                else self._embed_h(h0, bp, self.Kp))
        c0_p = (jnp.zeros((bp, self.Hg), jnp.float32) if c0 is None
                else self._embed_h(c0, bp, self.Hg))

        hseq_p, c_last_p = _lstm_sequence(x_p, h0_p, c0_p, self.W4, self.b4,
                                          tb=tb, t_real=T)
        hseq = hseq_p[:T, :B, :self.hidden_size].astype(jnp.float32)
        return hseq, c_last_p[:B, :self.hidden_size]


# --------------------------------------------------------------------------- #
# Pure-JAX references                                                          #
# --------------------------------------------------------------------------- #
def _ref_step_fused(x, h, c, model):
    """Mirrors the kernel math (bf16 matmul inputs, f32 accumulation / state)."""
    B = x.shape[0]
    H, I = model.hidden_size, model.input_size
    Hg, Kp, x_off = model.Hg, model.Kp, model.x_off
    bp = _round_up(B, 16)
    hx = jnp.zeros((bp, Kp), jnp.float32)
    hx = hx.at[:B, :H].set(h).at[:B, x_off:x_off + I].set(x).astype(jnp.bfloat16)
    c_p = jnp.zeros((bp, Hg), jnp.float32).at[:B, :H].set(c)
    z = jnp.dot(hx, model.W4, preferred_element_type=jnp.float32) + model.b4
    ft = jax.nn.sigmoid(z[:, 0 * Hg:1 * Hg])
    it = jax.nn.sigmoid(z[:, 1 * Hg:2 * Hg])
    ot = jax.nn.sigmoid(z[:, 2 * Hg:3 * Hg])
    gt = jnp.tanh(z[:, 3 * Hg:4 * Hg])
    c_new = ft * c_p + it * gt
    h_new = ot * jnp.tanh(c_new)
    return h_new[:B, :H], c_new[:B, :H]


def _ref_step_f32(x, h, c, m):
    """Exact torch-module semantics in f32 (coarser check vs bf16 weights)."""
    inp = jnp.concatenate([h, x], axis=1)
    ft = jax.nn.sigmoid(inp @ m.Wf.T + m.bf)
    it = jax.nn.sigmoid(inp @ m.Wi.T + m.bi)
    ot = jax.nn.sigmoid(inp @ m.Wo.T + m.bo)
    gt = jnp.tanh(inp @ m.Wg.T + m.bg)
    c_new = ft * c + it * gt
    return ot * jnp.tanh(c_new), c_new


if __name__ == "__main__":
    input_size, hidden_size, batch, seq_len = 16, 32, 2, 32
    key = jax.random.PRNGKey(0)
    kparam, kx, kseq = jax.random.split(key, 3)

    model = LSTMPallas(input_size, hidden_size, kparam, time_block=8)
    x = jax.random.normal(kx, (batch, input_size), jnp.float32)

    # ---- per-step path (matches the torch module's forward) ----------------
    h1, _, _ = model.forward(x, None)       # hidden=None path (zero init)
    h2, _, _ = model.forward(x, h1)         # reuse hidden / cell state
    jax.block_until_ready(h2)

    h0 = jnp.zeros((batch, hidden_size), jnp.float32)
    c0 = jnp.zeros((batch, hidden_size), jnp.float32)
    h1r, c1r = _ref_step_fused(x, h0, c0, model)
    h2r, c2r = _ref_step_fused(x, h1r, c1r, model)
    assert jnp.allclose(h1, h1r, atol=2e-2, rtol=2e-2), "step-1 mismatch"
    assert jnp.allclose(h2, h2r, atol=2e-2, rtol=2e-2), "step-2 mismatch"

    h1f, c1f = _ref_step_f32(x, h0, c0, model)
    h2f, _ = _ref_step_f32(x, h1f, c1f, model)
    assert jnp.allclose(h1, h1f, atol=5e-2), "step-1 vs f32 reference mismatch"
    assert jnp.allclose(h2, h2f, atol=5e-2), "step-2 vs f32 reference mismatch"

    # ---- time-blocked, weight-stationary sequence kernel -------------------
    x_seq = jax.random.normal(kseq, (seq_len, batch, input_size), jnp.float32)
    hseq, c_last = model.forward_sequence(x_seq)
    jax.block_until_ready(hseq)

    h_r, c_r = h0, c0
    hs_ref = []
    for t in range(seq_len):
        h_r, c_r = _ref_step_fused(x_seq[t], h_r, c_r, model)
        hs_ref.append(h_r)
    hs_ref = jnp.stack(hs_ref)
    assert jnp.allclose(hseq, hs_ref, atol=3e-2, rtol=3e-2), "sequence mismatch"
    assert jnp.allclose(c_last, c_r, atol=3e-2, rtol=3e-2), "final cell mismatch"

    print("KERNEL_OK")
</pallas_src>

<mosaic_0001>
module attributes {stable_mosaic.version = 11 : i64} {
  func.func @_lstm_cell_kernel(%arg0: memref<16x128xbf16, #tpu.memory_space<vmem>>, %arg1: memref<16x128xbf16, #tpu.memory_space<vmem>>, %arg2: memref<16x128xf32, #tpu.memory_space<vmem>>, %arg3: memref<128x512xbf16, #tpu.memory_space<vmem>>, %arg4: memref<1x512xf32, #tpu.memory_space<vmem>>, %arg5: memref<16x128xf32, #tpu.memory_space<vmem>>, %arg6: memref<16x128xf32, #tpu.memory_space<vmem>>) attributes {dimension_semantics = [], scalar_prefetch = 0 : i64, scratch_operands = 0 : i64, tpu.core_type = #tpu.core_type<tc>} {
    %c0 = arith.constant 0 : index
    %c0_0 = arith.constant 0 : index
    %0 = vector.load %arg0[%c0, %c0_0] : memref<16x128xbf16, #tpu.memory_space<vmem>>, vector<16x128xbf16>
    %c0_1 = arith.constant 0 : index
    %c0_2 = arith.constant 0 : index
    %1 = vector.load %arg1[%c0_1, %c0_2] : memref<16x128xbf16, #tpu.memory_space<vmem>>, vector<16x128xbf16>
    %2 = arith.addf %0, %1 : vector<16x128xbf16>
    %c0_3 = arith.constant 0 : index
    %c0_4 = arith.constant 0 : index
    %3 = vector.load %arg3[%c0_3, %c0_4] : memref<128x512xbf16, #tpu.memory_space<vmem>>, vector<128x512xbf16>
    %cst = arith.constant dense<0.000000e+00> : vector<16x512xf32>
    %4 = tpu.matmul %2, %3, %cst {dimension_numbers = #tpu.dot_dimension_numbers<[1], [0], [0], [1], [0, 0, 1, 1], [], []>} : vector<16x128xbf16>, vector<128x512xbf16>, vector<16x512xf32> -> vector<16x512xf32>
    %c0_5 = arith.constant 0 : index
    %c0_6 = arith.constant 0 : index
    %5 = vector.load %arg4[%c0_5, %c0_6] : memref<1x512xf32, #tpu.memory_space<vmem>>, vector<1x512xf32>
    %6 = vector.broadcast %5 : vector<1x512xf32> to vector<16x512xf32>
    %7 = arith.addf %4, %6 : vector<16x512xf32>
    %8 = vector.extract_strided_slice %7 {offsets = [0, 0], sizes = [16, 128], strides = [1, 1]} : vector<16x512xf32> to vector<16x128xf32>
    %cst_7 = arith.constant 5.000000e-01 : f32
    %9 = vector.broadcast %cst_7 : f32 to vector<16x128xf32>
    %10 = arith.mulf %9, %8 : vector<16x128xf32>
    %11 = math.tanh %10 : vector<16x128xf32>
    %cst_8 = arith.constant 5.000000e-01 : f32
    %12 = vector.broadcast %cst_8 : f32 to vector<16x128xf32>
    %13 = arith.mulf %12, %11 : vector<16x128xf32>
    %cst_9 = arith.constant 5.000000e-01 : f32
    %14 = vector.broadcast %cst_9 : f32 to vector<16x128xf32>
    %15 = arith.addf %13, %14 : vector<16x128xf32>
    %16 = vector.extract_strided_slice %7 {offsets = [0, 128], sizes = [16, 128], strides = [1, 1]} : vector<16x512xf32> to vector<16x128xf32>
    %cst_10 = arith.constant 5.000000e-01 : f32
    %17 = vector.broadcast %cst_10 : f32 to vector<16x128xf32>
    %18 = arith.mulf %17, %16 : vector<16x128xf32>
    %19 = math.tanh %18 : vector<16x128xf32>
    %cst_11 = arith.constant 5.000000e-01 : f32
    %20 = vector.broadcast %cst_11 : f32 to vector<16x128xf32>
    %21 = arith.mulf %20, %19 : vector<16x128xf32>
    %cst_12 = arith.constant 5.000000e-01 : f32
    %22 = vector.broadcast %cst_12 : f32 to vector<16x128xf32>
    %23 = arith.addf %21, %22 : vector<16x128xf32>
    %24 = vector.extract_strided_slice %7 {offsets = [0, 256], sizes = [16, 128], strides = [1, 1]} : vector<16x512xf32> to vector<16x128xf32>
    %cst_13 = arith.constant 5.000000e-01 : f32
    %25 = vector.broadcast %cst_13 : f32 to vector<16x128xf32>
    %26 = arith.mulf %25, %24 : vector<16x128xf32>
    %27 = math.tanh %26 : vector<16x128xf32>
    %cst_14 = arith.constant 5.000000e-01 : f32
    %28 = vector.broadcast %cst_14 : f32 to vector<16x128xf32>
    %29 = arith.mulf %28, %27 : vector<16x128xf32>
    %cst_15 = arith.constant 5.000000e-01 : f32
    %30 = vector.broadcast %cst_15 : f32 to vector<16x128xf32>
    %31 = arith.addf %29, %30 : vector<16x128xf32>
    %32 = vector.extract_strided_slice %7 {offsets = [0, 384], sizes = [16, 128], strides = [1, 1]} : vector<16x512xf32> to vector<16x128xf32>
    %33 = math.tanh %32 : vector<16x128xf32>
    %c0_16 = arith.constant 0 : index
    %c0_17 = arith.constant 0 : index
    %34 = vector.load %arg2[%c0_16, %c0_17] : memref<16x128xf32, #tpu.memory_space<vmem>>, vector<16x128xf32>
    %35 = arith.mulf %15, %34 : vector<16x128xf32>
    %36 = arith.mulf %23, %33 : vector<16x128xf32>
    %37 = arith.addf %35, %36 : vector<16x128xf32>
    %c0_18 = arith.constant 0 : index
    %c0_19 = arith.constant 0 : index
    %38 = vector.load %arg6[%c0_18, %c0_19] : memref<16x128xf32, #tpu.memory_space<vmem>>, vector<16x128xf32>
    tpu.vector_store %arg6[%c0_18, %c0_19], %37 {strides = array<i32>} : memref<16x128xf32, #tpu.memory_space<vmem>>, vector<16x128xf32>,
    %39 = math.tanh %37 : vector<16x128xf32>
    %40 = arith.mulf %31, %39 : vector<16x128xf32>
    %c0_20 = arith.constant 0 : index
    %c0_21 = arith.constant 0 : index
    %41 = vector.load %arg5[%c0_20, %c0_21] : memref<16x128xf32, #tpu.memory_space<vmem>>, vector<16x128xf32>
    tpu.vector_store %arg5[%c0_20, %c0_21], %40 {strides = array<i32>} : memref<16x128xf32, #tpu.memory_space<vmem>>, vector<16x128xf32>,
    return
  }
}

</mosaic_0001>

<bundles_post_ra>
// kernel: _lstm_step.1
= control target key start
LH: loop header
LB: loop body
LE: loop exit
PB: predicated region body
PF: predicated region fallthrough
CT: control target
= control target key end

     0   :  { %12 = vsyncpa [#allocation3], 0  ;;  %s730_s0 = inlined_call_operand.vmem [shape: bf16[16,128], index: 0, kind: input, shape index: {}]   ;;  %s731_s1 = inlined_call_operand.vmem [shape: bf16[16,128], index: 1, kind: input, shape index: {}]   ;;  %s732_s2 = inlined_call_operand.vmem [shape: f32[16,128], index: 2, kind: input, shape index: {}, may-alias: {2,6}]   ;;  %s733_s3 = inlined_call_operand.hbm [shape: bf16[128,512], index: 3, kind: input, shape index: {}]   ;;  %s734_s4 = inlined_call_operand.hbm [shape: f32[1,512], index: 4, kind: input, shape index: {}]   ;;  %s735_s5 = inlined_call_operand.hbm [shape: f32[16,128], index: 5, kind: output, shape index: {0}]   ;;  %s736_s6 = inlined_call_operand.vmem [shape: f32[16,128], index: 6, kind: output, shape index: {1}, may-alias: {2,6}]  }
   0x1   :  { %13 = vsyncpa [#allocation6], 0 }
   0x2   :  { %14 = vsyncpa [#allocation4], 0  ;;  %s25_s23 = sshll.u32 %s733_s3, 4  ;;  %s661_s24 = smov [#allocation2]   ;;  %s26_s23 = int_to_ptr.hbm [resolvable:$true] %s25_s23 }
   0x3   :  { %s27_s25 = sshll.u32 %s661_s24, 4  ;;  %s39_s28 = sshll.u32 %s734_s4, 4  ;;  %s28_s25 = int_to_ptr.vmem [resolvable:$true] %s27_s25  ;;  %s40_s28 = int_to_ptr.hbm [resolvable:$true] %s39_s28 }
   0x4   :  { %s662_s29 = smov 256   ;;  %s663_s30 = smov 16  }
   0x5   :  { %33 = dma.hbm_to_vmem [thread:$0]  %s26_s23, 4096, %s28_s25, [#allocation3], %s662_s29, %s662_s29, %s663_s30  }
   0x6   :  { %s664_s7 = smov [#allocation5]  }
   0x7   :  { %s41_s8 = sshll.u32 %s664_s7, 4  ;;  %s42_s8 = int_to_ptr.vmem [resolvable:$true] %s41_s8 }
   0x8   :  { %44 = dma.hbm_to_vmem [thread:$0]  %s40_s28, 64, %s42_s8, [#allocation6]  }
   0x9   :  { %655 = dma.done.wait [#allocation3], 4096  }
   0xa   :  { %656 = vsyncadd [#allocation3], 4294963200 }
   0xb   :  { %657 = dma.done.wait [#allocation6], 64  }
   0xc   :  { %658 = vsyncadd [#allocation6], 4294967232  ;;  %v502_v0 = vld [vmem:[#allocation2 + $0xe0] sm:$0xf]  ;;  %v546_v1 = vld [vmem:[#allocation2 + $0xec] sm:$0xf0] }
   0xd   :  { %v544_v2 = vld [vmem:[#allocation2 + $0xe4] sm:$0xf]  ;;  %v503_v3 = vor.u32 %v546_v1, %v502_v0  ;;  %v504_v4 = vld [vmem:[#allocation2 + $0xf0] sm:$0xf0]  ;;  %v510_v5 = vld [vmem:[#allocation2 + $0xe8] sm:$0xf] }
   0xe   :  { %v547_v6 = vld [vmem:[#allocation2 + $0xf4] sm:$0xf0]  ;;  %v507_v7 = vor.u32 %v544_v2, %v504_v4  ;;  %v545_v9 = vld [vmem:[#allocation2 + $0xec] sm:$0xf]  ;;  %v512_v10 = vld [vmem:[#allocation2 + $0xf8] sm:$0xf0] }
   0xf   :  { %v511_v8 = vor.u32 %v547_v6, %v510_v5  ;;  %v486_v11 = vld [vmem:[#allocation2 + $0xc0] sm:$0xf]  ;;  %266 = vmatpush.bf16.msra.mxu0 %v503_v3  ;;  %v515_v12 = vor.u32 %v545_v9, %v512_v10  ;;  %v542_v13 = vld [vmem:[#allocation2 + $0xcc] sm:$0xf0]  ;;  %v540_v14 = vld [vmem:[#allocation2 + $0xc4] sm:$0xf] }
  0x10   :  { %v488_v15 = vld [vmem:[#allocation2 + $0xd0] sm:$0xf0]  ;;  %280 = vmatpush.bf16.msra.mxu1 %v507_v7  ;;  %v487_v16 = vor.u32 %v542_v13, %v486_v11  ;;  %v494_v18 = vld [vmem:[#allocation2 + $0xc8] sm:$0xf]  ;;  %v543_v19 = vld [vmem:[#allocation2 + $0xd4] sm:$0xf0] }
  0x11   :  { %294 = vmatpush.bf16.msra.mxu2 %v511_v8  ;;  %v491_v17 = vor.u32 %v540_v14, %v488_v15  ;;  %v541_v20 = vld [vmem:[#allocation2 + $0xcc] sm:$0xf]  ;;  %308 = vmatpush.bf16.msra.mxu3 %v515_v12  ;;  %v495_v21 = vor.u32 %v543_v19, %v494_v18  ;;  %v496_v22 = vld [vmem:[#allocation2 + $0xd8] sm:$0xf0]  ;;  %v470_v23 = vld [vmem:[#allocation2 + $0xa0] sm:$0xf] }
  0x12   :  { %v538_v24 = vld [vmem:[#allocation2 + $0xac] sm:$0xf0]  ;;  %v499_v25 = vor.u32 %v541_v20, %v496_v22  ;;  %v536_v26 = vld [vmem:[#allocation2 + $0xa4] sm:$0xf]  ;;  %v472_v27 = vld [vmem:[#allocation2 + $0xb0] sm:$0xf0] }
  0x13   :  { %v478_v28 = vld [vmem:[#allocation2 + $0xa8] sm:$0xf]  ;;  %267 = vmatpush.bf16.msra.mxu0 %v487_v16  ;;  %v471_v29 = vor.u32 %v538_v24, %v470_v23  ;;  %v539_v30 = vld [vmem:[#allocation2 + $0xb4] sm:$0xf0]  ;;  %v537_v31 = vld [vmem:[#allocation2 + $0xac] sm:$0xf]  ;;  %v475_v33 = vor.u32 %v536_v26, %v472_v27 }
  0x14   :  { %v480_v32 = vld [vmem:[#allocation2 + $0xb8] sm:$0xf0]  ;;  %281 = vmatpush.bf16.msra.mxu1 %v491_v17  ;;  %v479_v34 = vor.u32 %v539_v30, %v478_v28  ;;  %v454_v35 = vld [vmem:[#allocation2 + $0x80] sm:$0xf]  ;;  %v534_v36 = vld [vmem:[#allocation2 + $0x8c] sm:$0xf0] }
  0x15   :  { %295 = vmatpush.bf16.msra.mxu2 %v495_v21  ;;  %v532_v37 = vld [vmem:[#allocation2 + $0x84] sm:$0xf]  ;;  %309 = vmatpush.bf16.msra.mxu3 %v499_v25  ;;  %v483_v38 = vor.u32 %v537_v31, %v480_v32  ;;  %v456_v39 = vld [vmem:[#allocation2 + $0x90] sm:$0xf0]  ;;  %v462_v40 = vld [vmem:[#allocation2 + $0x88] sm:$0xf]  ;;  %v455_v44 = vor.u32 %v534_v36, %v454_v35 }
  0x16   :  { %v535_v41 = vld [vmem:[#allocation2 + $0x94] sm:$0xf0]  ;;  %v533_v42 = vld [vmem:[#allocation2 + $0x8c] sm:$0xf]  ;;  %v464_v43 = vld [vmem:[#allocation2 + $0x98] sm:$0xf0]  ;;  %v459_v45 = vor.u32 %v532_v37, %v456_v39 }
  0x17   :  { %268 = vmatpush.bf16.msra.mxu0 %v471_v29  ;;  %v463_v46 = vor.u32 %v535_v41, %v462_v40  ;;  %v438_v47 = vld [vmem:[#allocation2 + $0x60] sm:$0xf]  ;;  %v530_v48 = vld [vmem:[#allocation2 + $0x6c] sm:$0xf0]  ;;  %v528_v49 = vld [vmem:[#allocation2 + $0x64] sm:$0xf]  ;;  %v467_v50 = vor.u32 %v533_v42, %v464_v43 }
  0x18   :  { %282 = vmatpush.bf16.msra.mxu1 %v475_v33  ;;  %v440_v51 = vld [vmem:[#allocation2 + $0x70] sm:$0xf0]  ;;  %v446_v52 = vld [vmem:[#allocation2 + $0x68] sm:$0xf]  ;;  %v531_v53 = vld [vmem:[#allocation2 + $0x74] sm:$0xf0]  ;;  %v439_v56 = vor.u32 %v530_v48, %v438_v47 }
  0x19   :  { %296 = vmatpush.bf16.msra.mxu2 %v479_v34  ;;  %310 = vmatpush.bf16.msra.mxu3 %v483_v38  ;;  %v529_v54 = vld [vmem:[#allocation2 + $0x6c] sm:$0xf]  ;;  %v448_v55 = vld [vmem:[#allocation2 + $0x78] sm:$0xf0]  ;;  %v443_v57 = vor.u32 %v528_v49, %v440_v51  ;;  %v447_v58 = vor.u32 %v531_v53, %v446_v52  ;;  %v422_v59 = vld [vmem:[#allocation2 + $0x40] sm:$0xf] }
  0x1a   :  { %v526_v60 = vld [vmem:[#allocation2 + $0x4c] sm:$0xf0]  ;;  %v524_v61 = vld [vmem:[#allocation2 + $0x44] sm:$0xf]  ;;  %v451_v62 = vor.u32 %v529_v54, %v448_v55  ;;  %v424_v63 = vld [vmem:[#allocation2 + $0x50] sm:$0xf0] }
  0x1b   :  { %269 = vmatpush.bf16.msra.mxu0 %v455_v44  ;;  %v430_v0 = vld [vmem:[#allocation2 + $0x48] sm:$0xf]  ;;  %v527_v1 = vld [vmem:[#allocation2 + $0x54] sm:$0xf0]  ;;  %v525_v2 = vld [vmem:[#allocation2 + $0x4c] sm:$0xf]  ;;  %v423_v4 = vor.u32 %v526_v60, %v422_v59  ;;  %v427_v7 = vor.u32 %v524_v61, %v424_v63 }
  0x1c   :  { %283 = vmatpush.bf16.msra.mxu1 %v459_v45  ;;  %v432_v3 = vld [vmem:[#allocation2 + $0x58] sm:$0xf0]  ;;  %v406_v5 = vld [vmem:[#allocation2 + $0x20] sm:$0xf]  ;;  %v522_v6 = vld [vmem:[#allocation2 + $0x2c] sm:$0xf0]  ;;  %v431_v8 = vor.u32 %v527_v1, %v430_v0 }
  0x1d   :  { %297 = vmatpush.bf16.msra.mxu2 %v463_v46  ;;  %311 = vmatpush.bf16.msra.mxu3 %v467_v50  ;;  %v520_v9 = vld [vmem:[#allocation2 + $0x24] sm:$0xf]  ;;  %v408_v10 = vld [vmem:[#allocation2 + $0x30] sm:$0xf0]  ;;  %v414_v11 = vld [vmem:[#allocation2 + $0x28] sm:$0xf]  ;;  %v435_v12 = vor.u32 %v525_v2, %v432_v3  ;;  %v407_v21 = vor.u32 %v522_v6, %v406_v5 }
  0x1e   :  { %v523_v13 = vld [vmem:[#allocation2 + $0x34] sm:$0xf0]  ;;  %v549_v14 = vld [vmem:[%s730_s0] sm:$0xff]   ;;  %v521_v16 = vld [vmem:[#allocation2 + $0x2c] sm:$0xf]  ;;  %v411_v23 = vor.u32 %v520_v9, %v408_v10  ;;  %s370_s20 = sshll.u32 %s735_s5, 4  ;;  %s371_s20 = int_to_ptr.hbm [resolvable:$true] %s370_s20 }
  0x1f   :  { %270 = vmatpush.bf16.msra.mxu0 %v439_v56  ;;  %v553_v15 = vld [vmem:[%s731_s1] sm:$0xff]   ;;  %v416_v17 = vld [vmem:[#allocation2 + $0x38] sm:$0xf0]  ;;  %v550_v18 = vunpack.c.l.bf16 %v549_v14  ;;  %v551_v19 = vunpack.c.h.bf16 %v549_v14  ;;  %v415_v24 = vor.u32 %v523_v13, %v414_v11  ;;  %v518_v26 = vld [vmem:[#allocation2 + $0xc] sm:$0xf0]  ;;  %s666_s21 = smov 128  }
  0x20   :  { %284 = vmatpush.bf16.msra.mxu1 %v443_v57  ;;  %v554_v20 = vunpack.c.l.bf16 %v553_v15  ;;  %v555_v22 = vunpack.c.h.bf16 %v553_v15  ;;  %v390_v25 = vld [vmem:[#allocation2] sm:$0xf]  ;;  %v516_v27 = vld [vmem:[#allocation2 + $0x4] sm:$0xf]  ;;  %v419_v28 = vor.u32 %v521_v16, %v416_v17  ;;  %v392_v29 = vld [vmem:[#allocation2 + $0x10] sm:$0xf0] }
  0x21   :  { %298 = vmatpush.bf16.msra.mxu2 %v447_v58  ;;  %312 = vmatpush.bf16.msra.mxu3 %v451_v62  ;;  %v398_v30 = vld [vmem:[#allocation2 + $0x8] sm:$0xf]  ;;  %v519_v31 = vld [vmem:[#allocation2 + $0x14] sm:$0xf0]  ;;  %v517_v32 = vld [vmem:[#allocation2 + $0xc] sm:$0xf]  ;;  %v391_v36 = vor.u32 %v518_v26, %v390_v25  ;;  %v395_v37 = vor.u32 %v516_v27, %v392_v29 }
  0x22   :  { %v400_v33 = vld [vmem:[#allocation2 + $0x18] sm:$0xf0]  ;;  %v61_v34 = vadd.f32 %v554_v20, %v550_v18  ;;  %v62_v35 = vadd.f32 %v555_v22, %v551_v19  ;;  %v399_v38 = vor.u32 %v519_v31, %v398_v30  ;;  %v96_v41 = vld [vmem:[#allocation5] sm:$0xf]  ;;  %v349_v20 = vld [vmem:[%s732_s2 + $0x8] sm:$0xff]  ;;  %s667_s22 = smov 8  }
  0x23   :  { %271 = vmatpush.bf16.msra.mxu0 %v423_v4  ;;  %v403_v39 = vor.u32 %v517_v32, %v400_v33  ;;  %v98_v42 = vperm.slane %v96_v41, 0  ;;  %v99_v43 = vperm.slane %v96_v41, 1  ;;  %v100_v50 = vperm.slane %v96_v41, 2  ;;  %v348_v2 = vld [vmem:[%s732_s2] sm:$0xff]  ;;  %s665_s2 = smov [#allocation7]  }
  0x24   :  { %285 = vmatpush.bf16.msra.mxu1 %v427_v7  ;;  %v63_v40 = vpack.c.bf16 %v62_v35, %v61_v34  ;;  %v101_v51 = vperm.slane %v96_v41, 3  ;;  %s368_s17 = sshll.u32 %s665_s2, 4  ;;  %s369_s17 = int_to_ptr.vmem [resolvable:$true] %s368_s17 }
  0x25   :  { %299 = vmatpush.bf16.msra.mxu2 %v431_v8  ;;  %313 = vmatpush.bf16.msra.mxu3 %v435_v12 }
  0x27   :  { %272 = vmatpush.bf16.msra.mxu0 %v407_v21 }
  0x28   :  { %286 = vmatpush.bf16.msra.mxu1 %v411_v23 }
  0x29   :  { %300 = vmatpush.bf16.msra.mxu2 %v415_v24  ;;  %314 = vmatpush.bf16.msra.mxu3 %v419_v28 }
  0x2b   :  { %273 = vmatpush.bf16.msra.mxu0 %v391_v36 }
  0x2c   :  { %287 = vmatpush.bf16.msra.mxu1 %v395_v37 }
  0x2d   :  { %301 = vmatpush.bf16.msra.mxu2 %v399_v38  ;;  %315 = vmatpush.bf16.msra.mxu3 %v403_v39 }
  0x2e   :  { %274 = vmatmul.bf16.vlgmr.msra.gmra.mxu0 %v63_v40 }
  0x2f   :  { %288 = vmatmul.bf16.vlgmr.msra.gmra.mxu1 %v63_v40 }
  0x30   :  { %302 = vmatmul.bf16.vlgmr.msra.gmra.mxu2 %v63_v40  ;;  %316 = vmatmul.bf16.vlgmr.msra.gmra.mxu3 %v63_v40 }
  0xab   :  { %v275_v44 = vpop.f32.mrf.mxu0 }
  0xac   :  { %v276_v45 = vadd.f32 %v275_v44, %v98_v42  ;;  %v289_v46 = vpop.f32.mrf.mxu1 }
  0xad   :  { %v290_v47 = vadd.f32 %v289_v46, %v99_v43 }
  0xae   :  { %v322_v48 = vmul.f32 0.5, %v276_v45 }
  0xaf   :  { %v330_v49 = vmul.f32 0.5, %v290_v47 }
  0xb0   :  { %563 = vtanh.f32 %v322_v48 }
  0xb1   :  { %565 = vtanh.f32 %v330_v49 }
  0xb3   :  { %v303_v52 = vpop.f32.mrf.mxu2  ;;  %v317_v54 = vpop.f32.mrf.mxu3 }
  0xb4   :  { %v304_v53 = vadd.f32 %v303_v52, %v100_v50  ;;  %v277_v55 = vpop.f32.mrf.mxu0  ;;  %v318_v56 = vadd.f32 %v317_v54, %v101_v51  ;;  %v291_v58 = vpop.f32.mrf.mxu1 }
  0xb5   :  { %v278_v57 = vadd.f32 %v277_v55, %v98_v42  ;;  %v292_v60 = vadd.f32 %v291_v58, %v99_v43 }
  0xb6   :  { %v338_v59 = vmul.f32 0.5, %v304_v53  ;;  %v564_v61 = vpop.eup %563  ;;  %567 = vtanh.f32 %v318_v56 }
  0xb7   :  { %v323_v62 = vmul.f32 0.5, %v278_v57  ;;  %v566_v63 = vpop.eup %565  ;;  %v326_v0 = vmul.f32 0.5, %v564_v61  ;;  %v331_v1 = vmul.f32 0.5, %v292_v60 }
  0xb8   :  { %569 = vtanh.f32 %v338_v59  ;;  %v334_v3 = vmul.f32 0.5, %v566_v63 }
  0xb9   :  { %571 = vtanh.f32 %v323_v62  ;;  %v328_v4 = vadd.f32 0.5, %v326_v0 }
  0xba   :  { %573 = vtanh.f32 %v331_v1  ;;  %v336_v5 = vadd.f32 0.5, %v334_v3 }
  0xbb   :  { %v305_v6 = vpop.f32.mrf.mxu2  ;;  %v350_v7 = vmul.f32 %v348_v2, %v328_v4  ;;  %v319_v9 = vpop.f32.mrf.mxu3 }
  0xbc   :  { %v306_v8 = vadd.f32 %v305_v6, %v100_v50  ;;  %v568_v10 = vpop.eup %567  ;;  %v320_v11 = vadd.f32 %v319_v9, %v101_v51 }
  0xbd   :  { %v352_v13 = vmul.f32 %v568_v10, %v336_v5 }
  0xbe   :  { %v570_v12 = vpop.eup %569  ;;  %v339_v14 = vmul.f32 0.5, %v306_v8  ;;  %575 = vtanh.f32 %v320_v11 }
  0xbf   :  { %v572_v15 = vpop.eup %571  ;;  %v354_v17 = vadd.f32 %v352_v13, %v350_v7  ;;  %v342_v19 = vmul.f32 0.5, %v570_v12 }
  0xc0   :  { %v574_v16 = vpop.eup %573  ;;  %v327_v18 = vmul.f32 0.5, %v572_v15  ;;  %577 = vtanh.f32 %v339_v14 }
  0xc1   :  { %v335_v21 = vmul.f32 0.5, %v574_v16  ;;  %356 = vst [vmem:[%s736_s6] sm:$0xff] %v354_v17  ;;  %579 = vtanh.f32 %v354_v17  ;;  %v344_v26 = vadd.f32 0.5, %v342_v19 }
  0xc2   :  { %v329_v22 = vadd.f32 0.5, %v327_v18 }
  0xc3   :  { %v337_v23 = vadd.f32 0.5, %v335_v21 }
  0xc4   :  { %v351_v24 = vmul.f32 %v349_v20, %v329_v22  ;;  %v576_v25 = vpop.eup %575 }
  0xc5   :  { %v353_v27 = vmul.f32 %v576_v25, %v337_v23 }
  0xc6   :  { %v578_v28 = vpop.eup %577 }
  0xc7   :  { %v580_v29 = vpop.eup %579  ;;  %v355_v30 = vadd.f32 %v353_v27, %v351_v24  ;;  %v343_v32 = vmul.f32 0.5, %v578_v28 }
  0xc8   :  { %v360_v31 = vmul.f32 %v580_v29, %v344_v26 }
  0xc9   :  { %357 = vst [vmem:[%s736_s6 + $0x8] sm:$0xff] %v355_v30  ;;  %581 = vtanh.f32 %v355_v30  ;;  %v345_v33 = vadd.f32 0.5, %v343_v32 }
  0xca   :  { %362 = vst [vmem:[#allocation7] sm:$0xff] %v360_v31 }
  0xcf   :  { %v582_v34 = vpop.eup %581 }
  0xd0   :  { %v361_v35 = vmul.f32 %v582_v34, %v345_v33 }
  0xd2   :  { %363 = vst [vmem:[#allocation7 + $0x8] sm:$0xff] %v361_v35 }
  0xd3   :  { %376 = dma.vmem_to_hbm [thread:$0]  %s369_s17, 256, %s371_s20, [#allocation4], %s666_s21, %s666_s21, %s667_s22  }
  0xd4   :  { %659 = dma.done.wait [#allocation4], 256  }
  0xd5   :  { %660 = vsyncadd [#allocation4], 4294967040 }
  0xd6   :  { %385 = vsyncpa [#allocation3], 1 }
  0xd7   :  { %386 = vsyncpa [#allocation6], 1 }
  0xd8   :  { %387 = vsyncpa [#allocation4], 1 }

</bundles_post_ra>
